<compile_context>
chip_gen: v7x
topology: tpu7x:2x2x1
jax: 0.10.0
libtpu: 0.0.40
codegen_flags: <defaults>
</compile_context>

<pallas_src>
import functools

import jax
import jax.numpy as jnp
import numpy as np
from jax.experimental import pallas as pl
from jax.experimental.pallas import tpu as pltpu

_EPS = 1e-5


def _model_kernel(x_ref, aux_ref, p_ref, o_ref, *, inv_count):
    # x_ref:   (6, L)  stacked/zero-padded inputs, L = Ho * Wo
    # aux_ref: (8, L)  constants: row0 = validity mask, row1 = ones, rest 0
    # p_ref:   (8, 24) packed params: lanes 0:6 = [w1|w2], lanes 8:24 = w3ext
    hi = jax.lax.Precision.HIGHEST
    w12 = p_ref[:, 0:6]        # (8, 6)
    w3e = p_ref[:, 8:24]       # (8, 16) = [w3 | 0 | b3 | 0...]
    x = x_ref[...]             # (6, L)
    aux = aux_ref[...]         # (8, L)

    # Fused conv1 + conv2 (1x1 convs on the zero-padded slab): one MXU pass.
    # Conv biases b1+b2 are omitted: BN centering makes them irrelevant.
    v3 = jnp.dot(w12, x, preferred_element_type=jnp.float32, precision=hi)

    # TODO(synk): v4 = LayerNorm(8)(v3) in the reference is unused dead code
    # (and would raise in PyTorch since the last dim != 8); not emitted.

    # One-pass statistics over the Hp x Wp region: everything outside it is
    # exactly 0 in v3 (zero-padded inputs, no bias), so an unmasked whole-slab
    # sum equals the masked sum; divide by the true count.
    stacked = jnp.concatenate([v3, v3 * v3], axis=0)            # (16, L)
    s = jnp.sum(stacked, axis=-1, keepdims=True)                # (16, 1)
    mean = s[0:8] * inv_count
    var = s[8:16] * inv_count - mean * mean                     # biased var
    inv_bn = jax.lax.rsqrt(var + _EPS)
    # InstanceNorm of the BN output (N=1): its per-channel mean is exactly 0
    # and its variance is var/(var+eps), so BN+IN collapse to a single scale.
    scale = inv_bn * jax.lax.rsqrt(var * inv_bn * inv_bn + _EPS)

    # Sigmoid; the mask row doubles as conv3's zero padding (outer ring and
    # anything outside the Hp x Wp region becomes exactly 0).
    v7 = jax.nn.sigmoid((v3 - mean) * scale) * aux[0:1, :]      # (8, L)

    # conv3 (1x1, pad=1) emitted directly at the output resolution, with b3
    # folded into the contraction via the aux ones-row (masked-out lanes get
    # exactly b3, i.e. the padded-border value).
    v7e = jnp.concatenate([v7, aux], axis=0)                    # (16, L)
    o_ref[...] = jnp.dot(w3e, v7e, preferred_element_type=jnp.float32,
                         precision=hi)


def init_params(key):
    ks = jax.random.split(key, 6)
    return dict(
        w1=jax.random.normal(ks[0], (8, 3), jnp.float32) * 0.3,
        b1=jax.random.normal(ks[1], (8,), jnp.float32) * 0.1,
        w2=jax.random.normal(ks[2], (8, 3), jnp.float32) * 0.3,
        b2=jax.random.normal(ks[3], (8,), jnp.float32) * 0.1,
        w3=jax.random.normal(ks[4], (8, 8), jnp.float32) * 0.2,
        b3=jax.random.normal(ks[5], (8,), jnp.float32) * 0.1,
    )


def pack_params(params):
    # One (8, 24) VMEM operand, fields aligned to 8-lane boundaries:
    #   lanes 0:6   = [w1 | w2]
    #   lanes 8:16  = w3
    #   lane  16    = 0   (coefficient for the aux mask row)
    #   lane  17    = b3  (coefficient for the aux ones row -> bias fold)
    # b1, b2 are deliberately not packed: they cancel under BN centering.
    z = jnp.zeros((8, 1), jnp.float32)
    w12 = jnp.concatenate([params["w1"], params["w2"]], axis=1)          # (8, 6)
    w3e = jnp.concatenate([params["w3"], z, params["b3"][:, None]] + [z] * 6,
                          axis=1)                                        # (8, 16)
    return jnp.concatenate([w12, z, z, w3e], axis=1)                     # (8, 24)


@jax.jit
def model_forward(x1, x2, packed_params):
    # x1, x2: NCHW float32, N must be 1 (as in the reference script).
    N, Cin, H, W = x1.shape
    assert N == 1 and Cin == 3 and x2.shape == x1.shape
    Hp, Wp = H + 2, W + 2        # conv1/conv2 output resolution (pad=1)
    Ho, Wo = H + 4, W + 4        # conv3 output resolution (another pad=1)
    L = Ho * Wo

    # Stack both images on the channel (sublane) axis and zero-pad by 2
    # spatially (covers conv1/conv2 pad=1 AND conv3 pad=1); the reshape to the
    # flat lane axis is a free bitcast.  These two ops (concat + pad) are the
    # only real pre-kernel HLO work; there is no post-kernel slice.
    x = jnp.concatenate([x1[0], x2[0]], axis=0)                 # (6, H, W)
    x = jnp.pad(x, ((0, 0), (2, 2), (2, 2)))                    # (6, Ho, Wo)
    x = x.reshape(2 * Cin, L)                                   # (6, L)

    # Compile-time-constant aux block (zero runtime cost):
    #   row 0: validity mask of the Hp x Wp conv1/conv2 output region
    #   row 1: ones (carries conv3's bias b3 through the final contraction)
    aux = np.zeros((8, L), np.float32)
    m = np.zeros((Ho, Wo), np.float32)
    m[1:1 + Hp, 1:1 + Wp] = 1.0
    aux[0] = m.reshape(-1)
    aux[1] = 1.0
    aux = jnp.asarray(aux)

    kernel = functools.partial(_model_kernel, inv_count=1.0 / float(Hp * Wp))
    vmem = pl.BlockSpec(memory_space=pltpu.MemorySpace.VMEM)
    # Gridless single-core call: the whole problem is a few vregs.  If batched
    # (N > 1), add a leading grid axis over N with
    # dimension_semantics=("parallel",) so v7x's two TensorCores share it.
    out_slab = pl.pallas_call(
        kernel,
        out_shape=jax.ShapeDtypeStruct((8, L), jnp.float32),
        in_specs=[vmem, vmem, vmem],
        out_specs=vmem,
    )(x, aux, packed_params)

    # The slab IS the full padded conv3 output; reshape is a free bitcast.
    return out_slab.reshape(1, 8, Ho, Wo)


def _ref_forward(x1, x2, p):
    # Pure-JAX reference of the same semantics (includes the conv biases that
    # the kernel drops, demonstrating they cancel), for a correctness check.
    hi = jax.lax.Precision.HIGHEST
    pad = ((0, 0), (0, 0), (1, 1), (1, 1))
    x1p, x2p = jnp.pad(x1, pad), jnp.pad(x2, pad)
    v1 = jnp.einsum('nchw,oc->nohw', x1p, p['w1'], precision=hi) \
        + p['b1'][None, :, None, None]
    v2 = jnp.einsum('nchw,oc->nohw', x2p, p['w2'], precision=hi) \
        + p['b2'][None, :, None, None]
    v3 = v1 + v2
    mu = v3.mean(axis=(0, 2, 3), keepdims=True)
    var = ((v3 - mu) ** 2).mean(axis=(0, 2, 3), keepdims=True)
    v5 = (v3 - mu) * jax.lax.rsqrt(var + _EPS)
    m2 = v5.mean(axis=(2, 3), keepdims=True)
    var2 = ((v5 - m2) ** 2).mean(axis=(2, 3), keepdims=True)
    v6 = (v5 - m2) * jax.lax.rsqrt(var2 + _EPS)
    v7 = jax.nn.sigmoid(v6)
    v7p = jnp.pad(v7, pad)
    return jnp.einsum('nchw,oc->nohw', v7p, p['w3'], precision=hi) \
        + p['b3'][None, :, None, None]


if __name__ == "__main__":
    key = jax.random.PRNGKey(0)
    k1, k2, kp = jax.random.split(key, 3)
    x1 = jax.random.normal(k1, (1, 3, 16, 16), jnp.float32)
    x2 = jax.random.normal(k2, (1, 3, 16, 16), jnp.float32)
    params = init_params(kp)
    packed = pack_params(params)

    out = jax.block_until_ready(model_forward(x1, x2, packed))
    ref = jax.block_until_ready(_ref_forward(x1, x2, params))

    assert out.shape == (1, 8, 20, 20), out.shape
    assert np.allclose(np.asarray(out), np.asarray(ref), rtol=2e-4, atol=2e-4)
    print("KERNEL_OK")
</pallas_src>

<mosaic_0001>
module attributes {stable_mosaic.version = 11 : i64} {
  func.func @_model_kernel(%arg0: memref<6x400xf32, #tpu.memory_space<vmem>>, %arg1: memref<8x400xf32, #tpu.memory_space<vmem>>, %arg2: memref<8x24xf32, #tpu.memory_space<vmem>>, %arg3: memref<8x400xf32, #tpu.memory_space<vmem>>) attributes {dimension_semantics = [], scalar_prefetch = 0 : i64, scratch_operands = 0 : i64, tpu.core_type = #tpu.core_type<tc>} {
    %c0 = arith.constant 0 : index
    %c0_0 = arith.constant 0 : index
    %0 = vector.load %arg2[%c0, %c0_0] : memref<8x24xf32, #tpu.memory_space<vmem>>, vector<8x6xf32>
    %c0_1 = arith.constant 0 : index
    %c8 = arith.constant 8 : index
    %1 = vector.load %arg2[%c0_1, %c8] : memref<8x24xf32, #tpu.memory_space<vmem>>, vector<8x16xf32>
    %c0_2 = arith.constant 0 : index
    %c0_3 = arith.constant 0 : index
    %2 = vector.load %arg0[%c0_2, %c0_3] : memref<6x400xf32, #tpu.memory_space<vmem>>, vector<6x400xf32>
    %c0_4 = arith.constant 0 : index
    %c0_5 = arith.constant 0 : index
    %3 = vector.load %arg1[%c0_4, %c0_5] : memref<8x400xf32, #tpu.memory_space<vmem>>, vector<8x400xf32>
    %cst = arith.constant dense<0.000000e+00> : vector<8x400xf32>
    %4 = tpu.matmul %0, %2, %cst {dimension_numbers = #tpu.dot_dimension_numbers<[1], [0], [0], [1], [0, 0, 1, 1], [], []>, precision = #tpu.contract_precision<fp32>} : vector<8x6xf32>, vector<6x400xf32>, vector<8x400xf32> -> vector<8x400xf32>
    %5 = arith.mulf %4, %4 : vector<8x400xf32>
    %6 = tpu.concatenate %4, %5 in 0 : vector<8x400xf32>, vector<8x400xf32> -> vector<16x400xf32>
    %cst_6 = arith.constant dense<0.000000e+00> : vector<16xf32>
    %7 = vector.multi_reduction <add>, %6, %cst_6 [1] : vector<16x400xf32> to vector<16xf32>
    %8 = vector.shape_cast %7 : vector<16xf32> to vector<16x1xf32>
    %9 = vector.extract_strided_slice %8 {offsets = [0, 0], sizes = [8, 1], strides = [1, 1]} : vector<16x1xf32> to vector<8x1xf32>
    %cst_7 = arith.constant 0.00308641978 : f32
    %10 = vector.broadcast %cst_7 : f32 to vector<8x1xf32>
    %11 = arith.mulf %9, %10 : vector<8x1xf32>
    %12 = vector.extract_strided_slice %8 {offsets = [8, 0], sizes = [8, 1], strides = [1, 1]} : vector<16x1xf32> to vector<8x1xf32>
    %cst_8 = arith.constant 0.00308641978 : f32
    %13 = vector.broadcast %cst_8 : f32 to vector<8x1xf32>
    %14 = arith.mulf %12, %13 : vector<8x1xf32>
    %15 = arith.mulf %11, %11 : vector<8x1xf32>
    %16 = arith.subf %14, %15 : vector<8x1xf32>
    %cst_9 = arith.constant 9.99999974E-6 : f32
    %17 = vector.broadcast %cst_9 : f32 to vector<8x1xf32>
    %18 = arith.addf %16, %17 : vector<8x1xf32>
    %19 = math.rsqrt %18 : vector<8x1xf32>
    %20 = arith.mulf %16, %19 : vector<8x1xf32>
    %21 = arith.mulf %20, %19 : vector<8x1xf32>
    %cst_10 = arith.constant 9.99999974E-6 : f32
    %22 = vector.broadcast %cst_10 : f32 to vector<8x1xf32>
    %23 = arith.addf %21, %22 : vector<8x1xf32>
    %24 = math.rsqrt %23 : vector<8x1xf32>
    %25 = arith.mulf %19, %24 : vector<8x1xf32>
    %26 = vector.broadcast %11 : vector<8x1xf32> to vector<8x400xf32>
    %27 = arith.subf %4, %26 : vector<8x400xf32>
    %28 = vector.broadcast %25 : vector<8x1xf32> to vector<8x400xf32>
    %29 = arith.mulf %27, %28 : vector<8x400xf32>
    %30 = arith.negf %29 : vector<8x400xf32>
    %31 = math.exp %30 : vector<8x400xf32>
    %cst_11 = arith.constant 1.000000e+00 : f32
    %32 = vector.broadcast %cst_11 : f32 to vector<8x400xf32>
    %33 = arith.addf %32, %31 : vector<8x400xf32>
    %34 = arith.divf %32, %33 : vector<8x400xf32>
    %35 = vector.extract_strided_slice %3 {offsets = [0, 0], sizes = [1, 400], strides = [1, 1]} : vector<8x400xf32> to vector<1x400xf32>
    %36 = vector.broadcast %35 : vector<1x400xf32> to vector<8x400xf32>
    %37 = arith.mulf %34, %36 : vector<8x400xf32>
    %38 = tpu.concatenate %37, %3 in 0 : vector<8x400xf32>, vector<8x400xf32> -> vector<16x400xf32>
    %cst_12 = arith.constant dense<0.000000e+00> : vector<8x400xf32>
    %39 = tpu.matmul %1, %38, %cst_12 {dimension_numbers = #tpu.dot_dimension_numbers<[1], [0], [0], [1], [0, 0, 1, 1], [], []>, precision = #tpu.contract_precision<fp32>} : vector<8x16xf32>, vector<16x400xf32>, vector<8x400xf32> -> vector<8x400xf32>
    %c0_13 = arith.constant 0 : index
    %c0_14 = arith.constant 0 : index
    %40 = vector.load %arg3[%c0_13, %c0_14] : memref<8x400xf32, #tpu.memory_space<vmem>>, vector<8x400xf32>
    tpu.vector_store %arg3[%c0_13, %c0_14], %39 {strides = array<i32>} : memref<8x400xf32, #tpu.memory_space<vmem>>, vector<8x400xf32>,
    return
  }
}

</mosaic_0001>

<bundles_post_ra>
// kernel: model_forward.1
= control target key start
LH: loop header
LB: loop body
LE: loop exit
PB: predicated region body
PF: predicated region fallthrough
CT: control target
= control target key end

     0   :  { %vm27_vm0 = vcmask 1045504   ;;  %vm23_vm1 = vcmask 48128   ;;  %v2158_v3 = vmov 0.0   ;;  %vm976_vm2 = vcmask 130048   ;;  %s2344_s0 = inlined_call_operand.vmem [shape: f32[6,400], index: 0, kind: input, shape index: {}]   ;;  %s2345_s2 = inlined_call_operand.vmem [shape: f32[8,24], index: 2, kind: input, shape index: {}]   ;;  %s2346_s1 = inlined_call_operand.vmem [shape: f32[8,400], index: 1, kind: input, shape index: {}]   ;;  %s2347_s3 = inlined_call_operand.vmem [shape: f32[8,400], index: 3, kind: output, shape index: {}]  }
   0x1   :  { %v16_v0 = vld [vmem:[%s2344_s0 + $0x8] sm:$0x3f]  ;;  %v18_v1 = vld [vmem:[%s2344_s0 + $0x18] sm:$0x3f]  ;;  %v15_v2 = vld [vmem:[%s2344_s0] sm:$0x3f]  ;;  %106 = vmatprep.mubr.f32.mxu0 %v2158_v3  ;;  %571 = vmatprep.mubr.f32.mxu1 %v2158_v3 }
   0x2   :  { %v32_v4 = vsel %vm27_vm0, %v16_v0, 0  ;;  %v38_v5 = vsel %vm27_vm0, %v18_v1, 0  ;;  %v29_v6 = vsel %vm27_vm0, %v15_v2, 0  ;;  %v17_v7 = vld [vmem:[%s2344_s0 + $0x10] sm:$0x3f]  ;;  %v2200_v8 = vld [vmem:[%s2345_s2] sm:$0xff] }
   0x3   :  { %v40_v9 = vand.u32 4294901760, %v32_v4  ;;  %v505_v10 = vand.u32 4294901760, %v38_v5  ;;  %v2202_v11 = vand.u32 4294901760, %v29_v6  ;;  %v35_v12 = vsel %vm27_vm0, %v17_v7, 0  ;;  %s2159_s0 = smov 120  }
   0x4   :  { %v2205_v13 = vand.u32 4294901760, %v35_v12  ;;  %v25_v14 = vsel %vm23_vm1, %v2200_v8, 0  ;;  %1050 = vrot.lane.b32.xlu1 %v2200_v8, %s2159_s0 }
   0x5   :  { %41 = vmatprep.subr.mxu0 %v40_v9  ;;  %506 = vmatprep.subr.mxu1 %v505_v10  ;;  %v125_v15 = vsub.f32 %v29_v6, %v2202_v11  ;;  %v107_v16 = vand.u32 4294901760, %v25_v14  ;;  %v119_v17 = vsub.f32 %v32_v4, %v40_v9  ;;  %v584_v18 = vsub.f32 %v38_v5, %v505_v10 }
   0x6   :  { %43 = vmatpush1.msra.mxu0 %v2202_v11  ;;  %508 = vmatpush1.msra.mxu1 %v2205_v13  ;;  %v590_v19 = vsub.f32 %v35_v12, %v2205_v13 }
   0x7   :  { %v108_v20 = vsub.f32 %v25_v14, %v107_v16  ;;  %v120_v21 = vand.u32 4294901760, %v119_v17  ;;  %v126_v22 = vand.u32 4294901760, %v125_v15  ;;  %v585_v23 = vand.u32 4294901760, %v584_v18 }
   0x8   :  { %v591_v24 = vand.u32 4294901760, %v590_v19  ;;  %v1030_v14 = vlaneseq }
   0x9   :  { %v109_v25 = vand.u32 4294901760, %v108_v20  ;;  %v121_v26 = vsub.f32 %v119_v17, %v120_v21  ;;  %v127_v27 = vsub.f32 %v125_v15, %v126_v22  ;;  %v586_v28 = vsub.f32 %v584_v18, %v585_v23 }
   0xa   :  { %v592_v29 = vsub.f32 %v590_v19, %v591_v24 }
   0xb   :  { %v110_v30 = vsub.f32 %v108_v20, %v109_v25  ;;  %v122_v31 = vand.u32 4294901760, %v121_v26  ;;  %v587_v32 = vand.u32 4294901760, %v586_v28  ;;  %v128_v33 = vand.u32 4294901760, %v127_v27  ;;  %v20_v27 = vld [vmem:[%s2346_s1 + $0x8] sm:$0xff] }
   0xc   :  { %v593_v35 = vand.u32 4294901760, %v592_v29  ;;  %v1058_v29 = vand.u32 4294901760, %v20_v27 }
   0xd   :  { %v111_v34 = vand.u32 4294901760, %v110_v30  ;;  %123 = vmatprep.subr.mxu0 %v122_v31  ;;  %588 = vmatprep.subr.mxu1 %v587_v32  ;;  %v22_v30 = vld [vmem:[%s2346_s1 + $0x18] sm:$0xff]  ;;  %v19_v32 = vld [vmem:[%s2346_s1] sm:$0xff] }
   0xe   :  { %v1549_v31 = vand.u32 4294901760, %v22_v30 }
   0xf   :  { %112 = vmatmul.mubr.f32.vlgmr.msra.gmra.mrb[0].mxu0 %v111_v34  ;;  %577 = vmatmul.mubr.f32.vlgmr.msra.gmra.mrb[0].mxu1 %v111_v34  ;;  %v21_v34 = vld [vmem:[%s2346_s1 + $0x10] sm:$0xff] }
  0x10   :  { %129 = vmatpush1.msra.mxu0 %v128_v33  ;;  %192 = vmatprep.mubr.f32.mxu0 %v2158_v3  ;;  %v1060_v33 = vand.u32 4294901760, %v19_v32 }
  0x11   :  { %594 = vmatpush1.msra.mxu1 %v593_v35  ;;  %657 = vmatprep.mubr.f32.mxu1 %v2158_v3 }
  0x12   :  { %202 = vmatprep.subr.mxu0 %v119_v17  ;;  %667 = vmatprep.subr.mxu1 %v584_v18 }
  0x17   :  { %194 = vmatmul.mubr.f32.vlgmr.msra.gmra.mrb[0].mxu0 %v107_v16  ;;  %659 = vmatmul.mubr.f32.vlgmr.msra.gmra.mrb[0].mxu1 %v107_v16 }
  0x18   :  { %205 = vmatpush1.msra.mxu0 %v125_v15  ;;  %268 = vmatprep.mubr.f32.mxu0 %v2158_v3 }
  0x19   :  { %670 = vmatpush1.msra.mxu1 %v590_v19  ;;  %733 = vmatprep.mubr.f32.mxu1 %v2158_v3 }
  0x1a   :  { %278 = vmatprep.subr.mxu0 %v40_v9  ;;  %743 = vmatprep.subr.mxu1 %v505_v10 }
  0x1f   :  { %271 = vmatmul.mubr.f32.vlgmr.msra.gmra.mrb[0].mxu0 %v108_v20  ;;  %736 = vmatmul.mubr.f32.vlgmr.msra.gmra.mrb[0].mxu1 %v108_v20 }
  0x20   :  { %280 = vmatpush1.msra.mxu0 %v2202_v11  ;;  %343 = vmatprep.mubr.f32.mxu0 %v2158_v3 }
  0x21   :  { %745 = vmatpush1.msra.mxu1 %v2205_v13  ;;  %808 = vmatprep.mubr.f32.mxu1 %v2158_v3 }
  0x22   :  { %356 = vmatprep.subr.mxu0 %v120_v21  ;;  %821 = vmatprep.subr.mxu1 %v585_v23  ;;  %v1031_v21 = vshrl.u32 %v1030_v14, 7 }
  0x24   :  { %v1032_v28 = vsub.s32 0, %v1031_v21 }
  0x27   :  { %347 = vmatmul.mubr.f32.vlgmr.msra.gmra.mrb[0].mxu0 %v109_v25  ;;  %812 = vmatmul.mubr.f32.vlgmr.msra.gmra.mrb[0].mxu1 %v109_v25 }
  0x28   :  { %360 = vmatpush1.msra.mxu0 %v126_v22  ;;  %423 = vmatprep.mubr.f32.mxu0 %v2158_v3 }
  0x29   :  { %825 = vmatpush1.msra.mxu1 %v591_v24  ;;  %888 = vmatprep.mubr.f32.mxu1 %v2158_v3 }
  0x2a   :  { %432 = vmatprep.subr.mxu0 %v40_v9  ;;  %897 = vmatprep.subr.mxu1 %v505_v10 }
  0x2f   :  { %425 = vmatmul.mubr.f32.vlgmr.msra.gmra.mrb[0].mxu0 %v107_v16  ;;  %890 = vmatmul.mubr.f32.vlgmr.msra.gmra.mrb[0].mxu1 %v107_v16 }
  0x30   :  { %434 = vmatpush1.msra.mxu0 %v2202_v11  ;;  %497 = vmatprep.mubr.f32.mxu0 %v2158_v3 }
  0x31   :  { %899 = vmatpush1.msra.mxu1 %v2205_v13  ;;  %962 = vmatprep.mubr.f32.mxu1 %v2158_v3 }
  0x37   :  { %499 = vmatmul.mubr.f32.vlgmr.msra.gmra.mrb[0].mxu0 %v107_v16  ;;  %964 = vmatmul.mubr.f32.vlgmr.msra.gmra.mrb[0].mxu1 %v107_v16 }
  0x38   :  { %1122 = vmatprep.mubr.f32.mxu0 %v2158_v3  ;;  %1613 = vmatprep.mubr.f32.mxu1 %v2158_v3 }
  0x76   :  { %v1051_v15 = vpop.permute.xlu1 %1050 }
  0x77   :  { %v1052_v20 = vsel %vm976_vm2, %v1051_v15, 0 }
  0x78   :  { %v2233_v26 = vand.u32 4294901760, %v1052_v20 }
  0x7a   :  { %v2248_v35 = vsub.f32 %v1052_v20, %v2233_v26 }
 0x10a   :  { %v500_v36 = vpop.f32.mrb[0].mxu0  ;;  %v965_v37 = vpop.f32.mrb[0].mxu1 }
 0x10b   :  { %v970_v38 = vmul.f32 %v500_v36, %v500_v36  ;;  %v502_v39 = vpop.f32.mrb[1].mxu0  ;;  %v967_v40 = vpop.f32.mrb[1].mxu1  ;;  %v972_v44 = vmul.f32 %v965_v37, %v965_v37 }
 0x10c   :  { %v971_v41 = vmul.f32 %v502_v39, %v502_v39  ;;  %v974_v42 = vadd.f32 %v502_v39, %v500_v36  ;;  %v973_v43 = vmul.f32 %v967_v40, %v967_v40  ;;  %v977_v47 = vsel %vm976_vm2, %v967_v40, 0.0 }
 0x10e   :  { %v975_v45 = vadd.f32 %v974_v42, %v965_v37  ;;  %v981_v46 = vadd.f32 %v971_v41, %v970_v38  ;;  %v983_v50 = vsel %vm976_vm2, %v973_v43, 0.0  ;;  %v2250_v38 = vsub.f32 %v20_v27, %v1058_v29 }
 0x10f   :  { %v1033_v41 = vrot.slane %v19_v32, %v1032_v28  ;;  %v2254_v42 = vsub.f32 %v19_v32, %v1060_v33 }
 0x110   :  { %v978_v48 = vadd.f32 %v977_v47, %v975_v45  ;;  %v982_v49 = vadd.f32 %v981_v46, %v972_v44  ;;  %v2257_v44 = vand.u32 4294901760, %v2248_v35  ;;  %v1041_v45 = vrot.slane %v21_v34, %v1032_v28 }
 0x112   :  { %979 = vadd.xlane.f32.xlu0 %v978_v48  ;;  %v984_v51 = vadd.f32 %v983_v50, %v982_v49  ;;  %v1148_v49 = vand.u32 4294901760, %v2250_v38 }
 0x116   :  { %985 = vadd.xlane.f32.xlu0 %v984_v51 }
 0x19f   :  { %v980_v52 = vpop.xlane.xlu0 %979 }
 0x1a0   :  { %v987_v53 = vmul.f32 0.0030864198, %v980_v52 }
 0x1a2   :  { %v989_v55 = vmul.f32 %v987_v53, %v987_v53  ;;  %v998_v0 = vsub.f32 %v500_v36, %v987_v53  ;;  %v999_v1 = vsub.f32 %v502_v39, %v987_v53  ;;  %v1000_v2 = vsub.f32 %v965_v37, %v987_v53 }
 0x1a3   :  { %v986_v54 = vpop.xlane.xlu0 %985  ;;  %v1001_v4 = vsub.f32 %v967_v40, %v987_v53  ;;  %v1551_v36 = vand.u32 4294901760, %v21_v34  ;;  %v1037_v37 = vrot.slane %v20_v27, %v1032_v28  ;;  %v1045_v39 = vrot.slane %v22_v30, %v1032_v28 }
 0x1a4   :  { %v988_v56 = vmul.f32 0.0030864198, %v986_v54  ;;  %v2252_v40 = vsub.f32 %v22_v30, %v1549_v31 }
 0x1a5   :  { %v2259_v46 = vsub.f32 %v21_v34, %v1551_v36 }
 0x1a6   :  { %v990_v57 = vsub.f32 %v988_v56, %v989_v55  ;;  %v1639_v52 = vand.u32 4294901760, %v2252_v40  ;;  %v1154_v56 = vand.u32 4294901760, %v2254_v42 }
 0x1a8   :  { %v991_v58 = vadd.f32 1e-05, %v990_v57 }
 0x1aa   :  { %2138 = vrsqrt.f32 %v991_v58 }
 0x1b4   :  { %v2139_v59 = vpop.eup %2138 }
 0x1b5   :  { %v993_v60 = vmul.f32 %v2139_v59, %v990_v57 }
 0x1b7   :  { %v994_v61 = vmul.f32 %v2139_v59, %v993_v60  ;;  %v1645_v60 = vand.u32 4294901760, %v2259_v46 }
 0x1b9   :  { %v995_v62 = vadd.f32 1e-05, %v994_v61 }
 0x1bb   :  { %2140 = vrsqrt.f32 %v995_v62 }
 0x1c5   :  { %v2141_v63 = vpop.eup %2140 }
 0x1c6   :  { %v997_v5 = vmul.f32 %v2141_v63, %v2139_v59  ;;  %v1126_v59 = vsub.f32 %v2248_v35, %v2257_v44 }
 0x1c8   :  { %v1002_v6 = vmul.f32 %v998_v0, %v997_v5  ;;  %v1004_v7 = vmul.f32 %v1000_v2, %v997_v5  ;;  %v1003_v8 = vmul.f32 %v999_v1, %v997_v5  ;;  %v1005_v9 = vmul.f32 %v1001_v4, %v997_v5 }
 0x1c9   :  { %v1149_v0 = vsub.f32 %v2250_v38, %v1148_v49  ;;  %v1640_v5 = vsub.f32 %v2252_v40, %v1639_v52 }
 0x1ca   :  { %v2045_v10 = vmul.f32 -1.442695, %v1003_v8  ;;  %v2047_v11 = vmul.f32 -1.442695, %v1005_v9  ;;  %v2044_v12 = vmul.f32 -1.442695, %v1002_v6  ;;  %v1155_v9 = vsub.f32 %v2254_v42, %v1154_v56 }
 0x1cb   :  { %v2046_v13 = vmul.f32 -1.442695, %v1004_v7  ;;  %v1150_v15 = vand.u32 4294901760, %v1149_v0 }
 0x1cc   :  { %2142 = vpow2.f32 %v2045_v10 }
 0x1cd   :  { %2144 = vpow2.f32 %v2047_v11 }
 0x1ce   :  { %2146 = vpow2.f32 %v2044_v12 }
 0x1cf   :  { %2148 = vpow2.f32 %v2046_v13  ;;  %v1646_v13 = vsub.f32 %v2259_v46, %v1645_v60 }
 0x1d1   :  { %v1647_v27 = vand.u32 4294901760, %v1646_v13 }
 0x1d6   :  { %v2143_v16 = vpop.eup %2142 }
 0x1d7   :  { %v2145_v17 = vpop.eup %2144  ;;  %v1019_v18 = vadd.f32 1.0, %v2143_v16 }
 0x1d8   :  { %v2147_v19 = vpop.eup %2146  ;;  %v1021_v22 = vadd.f32 1.0, %v2145_v17  ;;  %v1127_v17 = vand.u32 4294901760, %v1126_v59 }
 0x1d9   :  { %v2149_v23 = vpop.eup %2148  ;;  %2150 = vrcp.f32 %v1019_v18  ;;  %v1018_v24 = vadd.f32 1.0, %v2147_v19  ;;  %v1641_v19 = vand.u32 4294901760, %v1640_v5 }
 0x1da   :  { %2152 = vrcp.f32 %v1021_v22  ;;  %v1020_v25 = vadd.f32 1.0, %v2149_v23  ;;  %v1156_v23 = vand.u32 4294901760, %v1155_v9 }
 0x1db   :  { %2154 = vrcp.f32 %v1018_v24 }
 0x1dc   :  { %2156 = vrcp.f32 %v1020_v25 }
 0x1e3   :  { %v2151_v43 = vpop.eup %2150 }
 0x1e4   :  { %v2153_v47 = vpop.eup %2152  ;;  %v1047_v48 = vmul.f32 %v2151_v43, %v1037_v37 }
 0x1e5   :  { %v2155_v50 = vpop.eup %2154  ;;  %v1049_v51 = vmul.f32 %v2153_v47, %v1045_v39 }
 0x1e6   :  { %v2157_v53 = vpop.eup %2156  ;;  %v1054_v54 = vand.u32 4294901760, %v1047_v48  ;;  %v1046_v55 = vmul.f32 %v2155_v50, %v1033_v41 }
 0x1e7   :  { %v1545_v57 = vand.u32 4294901760, %v1049_v51  ;;  %v1048_v58 = vmul.f32 %v2157_v53, %v1041_v45 }
 0x1e8   :  { %v2267_v61 = vpack.c.bf16 %v1058_v29, %v1054_v54  ;;  %v1135_v62 = vsub.f32 %v1047_v48, %v1054_v54  ;;  %v1056_v63 = vand.u32 4294901760, %v1046_v55 }
 0x1e9   :  { %v2272_v1 = vpack.c.bf16 %v1549_v31, %v1545_v57  ;;  %v1626_v2 = vsub.f32 %v1049_v51, %v1545_v57  ;;  %v1547_v4 = vand.u32 4294901760, %v1048_v58 }
 0x1ea   :  { %2049 = vmatprep.subr.bf16.mxu0 %v2267_v61  ;;  %v2278_v6 = vpack.c.bf16 %v1060_v33, %v1056_v63  ;;  %v1141_v7 = vsub.f32 %v1046_v55, %v1056_v63  ;;  %v1136_v8 = vand.u32 4294901760, %v1135_v62  ;;  %v2056_v34 = vpack.c.bf16 %v2250_v38, %v1135_v62 }
 0x1eb   :  { %2073 = vmatprep.subr.bf16.mxu1 %v2272_v1  ;;  %v2284_v10 = vpack.c.bf16 %v1551_v36, %v1547_v4  ;;  %v1632_v11 = vsub.f32 %v1048_v58, %v1547_v4  ;;  %v1627_v12 = vand.u32 4294901760, %v1626_v2  ;;  %v2080_v36 = vpack.c.bf16 %v2252_v40, %v1626_v2 }
 0x1ec   :  { %2051 = vmatpush1.bf16.msra.mxu0 %v2278_v6  ;;  %v1137_v14 = vsub.f32 %v1135_v62, %v1136_v8  ;;  %v1142_v16 = vand.u32 4294901760, %v1141_v7  ;;  %v2058_v37 = vpack.c.bf16 %v2254_v42, %v1141_v7  ;;  %v2064_v41 = vpack.c.bf16 %v1148_v49, %v1136_v8 }
 0x1ed   :  { %2075 = vmatpush1.bf16.msra.mxu1 %v2284_v10  ;;  %v1628_v18 = vsub.f32 %v1626_v2, %v1627_v12  ;;  %v1633_v20 = vand.u32 4294901760, %v1632_v11  ;;  %v2082_v39 = vpack.c.bf16 %v2259_v46, %v1632_v11  ;;  %v2088_v43 = vpack.c.bf16 %v1639_v52, %v1627_v12 }
 0x1ee   :  { %v1138_v21 = vand.u32 4294901760, %v1137_v14  ;;  %v1143_v22 = vsub.f32 %v1141_v7, %v1142_v16  ;;  %v2066_v45 = vpack.c.bf16 %v1154_v56, %v1142_v16 }
 0x1ef   :  { %1128 = vmatmul.mubr.f32.vlgmr.msra.gmra.mrb[2].mxu0 %v1127_v17  ;;  %v1629_v24 = vand.u32 4294901760, %v1628_v18  ;;  %v1634_v25 = vsub.f32 %v1632_v11, %v1633_v20  ;;  %v2090_v38 = vpack.c.bf16 %v1645_v60, %v1633_v20 }
 0x1f0   :  { %1619 = vmatmul.mubr.f32.vlgmr.msra.gmra.mrb[2].mxu1 %v1127_v17  ;;  %v2052_v28 = vpack.c.bf16 %v1150_v15, %v1138_v21  ;;  %v1144_v29 = vand.u32 4294901760, %v1143_v22  ;;  %1218 = vmatprep.mubr.f32.mxu0 %v2158_v3 }
 0x1f1   :  { %v2076_v30 = vpack.c.bf16 %v1641_v19, %v1629_v24  ;;  %v1635_v31 = vand.u32 4294901760, %v1634_v25  ;;  %1709 = vmatprep.mubr.f32.mxu1 %v2158_v3 }
 0x1f2   :  { %2053 = vmatprep.subr.bf16.mxu0 %v2052_v28  ;;  %v2054_v32 = vpack.c.bf16 %v1156_v23, %v1144_v29 }
 0x1f3   :  { %2077 = vmatprep.subr.bf16.mxu1 %v2076_v30  ;;  %v2078_v33 = vpack.c.bf16 %v1647_v27, %v1635_v31 }
 0x1f4   :  { %2055 = vmatpush1.bf16.msra.mxu0 %v2054_v32 }
 0x1f5   :  { %2079 = vmatpush1.bf16.msra.mxu1 %v2078_v33  ;;  %2057 = vmatprep.subr.bf16.mxu0 %v2056_v34 }
 0x1f6   :  { %2081 = vmatprep.subr.bf16.mxu1 %v2080_v36 }
 0x1f7   :  { %1220 = vmatmul.mubr.f32.vlgmr.msra.gmra.mrb[2].mxu0 %v2233_v26 }
 0x1f8   :  { %1711 = vmatmul.mubr.f32.vlgmr.msra.gmra.mrb[2].mxu1 %v2233_v26  ;;  %2059 = vmatpush1.bf16.msra.mxu0 %v2058_v37 }
 0x1f9   :  { %2083 = vmatpush1.bf16.msra.mxu1 %v2082_v39  ;;  %2061 = vmatprep.subr.bf16.mxu0 %v2267_v61 }
 0x1fa   :  { %2085 = vmatprep.subr.bf16.mxu1 %v2272_v1  ;;  %1298 = vmatprep.mubr.f32.mxu0 %v2158_v3 }
 0x1fb   :  { %1789 = vmatprep.mubr.f32.mxu1 %v2158_v3 }
 0x1ff   :  { %1301 = vmatmul.mubr.f32.vlgmr.msra.gmra.mrb[2].mxu0 %v2248_v35 }
 0x200   :  { %2063 = vmatpush1.bf16.msra.mxu0 %v2278_v6  ;;  %1792 = vmatmul.mubr.f32.vlgmr.msra.gmra.mrb[2].mxu1 %v2248_v35 }
 0x201   :  { %2087 = vmatpush1.bf16.msra.mxu1 %v2284_v10  ;;  %2065 = vmatprep.subr.bf16.mxu0 %v2064_v41 }
 0x202   :  { %2089 = vmatprep.subr.bf16.mxu1 %v2088_v43  ;;  %1375 = vmatprep.mubr.f32.mxu0 %v2158_v3 }
 0x203   :  { %1866 = vmatprep.mubr.f32.mxu1 %v2158_v3 }
 0x207   :  { %1379 = vmatmul.mubr.f32.vlgmr.msra.gmra.mrb[2].mxu0 %v2257_v44 }
 0x208   :  { %2067 = vmatpush1.bf16.msra.mxu0 %v2066_v45  ;;  %1870 = vmatmul.mubr.f32.vlgmr.msra.gmra.mrb[2].mxu1 %v2257_v44 }
 0x209   :  { %2091 = vmatpush1.bf16.msra.mxu1 %v2090_v38  ;;  %2069 = vmatprep.subr.bf16.mxu0 %v2267_v61 }
 0x20a   :  { %2093 = vmatprep.subr.bf16.mxu1 %v2272_v1  ;;  %1461 = vmatprep.mubr.f32.mxu0 %v2158_v3 }
 0x20b   :  { %1952 = vmatprep.mubr.f32.mxu1 %v2158_v3 }
 0x20f   :  { %1463 = vmatmul.mubr.f32.vlgmr.msra.gmra.mrb[2].mxu0 %v2233_v26 }
 0x210   :  { %2071 = vmatpush1.bf16.msra.mxu0 %v2278_v6  ;;  %1954 = vmatmul.mubr.f32.vlgmr.msra.gmra.mrb[2].mxu1 %v2233_v26 }
 0x211   :  { %2095 = vmatpush1.bf16.msra.mxu1 %v2284_v10  ;;  %1537 = vmatprep.mubr.f32.mxu0 %v2158_v3 }
 0x212   :  { %2028 = vmatprep.mubr.f32.mxu1 %v2158_v3 }
 0x217   :  { %1539 = vmatmul.mubr.f32.vlgmr.msra.gmra.mrb[2].mxu0 %v2233_v26 }
 0x218   :  { %2030 = vmatmul.mubr.f32.vlgmr.msra.gmra.mrb[2].mxu1 %v2233_v26 }
 0x2ea   :  { %v1540_v35 = vpop.f32.mrb[2].mxu0 }
 0x2eb   :  { %2036 = vst [vmem:[%s2347_s3] sm:$0xff] %v1540_v35  ;;  %v2031_v40 = vpop.f32.mrb[2].mxu1  ;;  %v1542_v42 = vpop.f32.mrb[3].mxu0 }
 0x2ec   :  { %2038 = vst [vmem:[%s2347_s3 + $0x10] sm:$0xff] %v2031_v40  ;;  %2037 = vst [vmem:[%s2347_s3 + $0x8] sm:$0xff] %v1542_v42  ;;  %v2033_v3 = vpop.f32.mrb[3].mxu1 }
 0x2ed   :  { %2039 = vst.msk [vmem:[%s2347_s3 + $0x18] sm:$0xff] %vm976_vm2, %v2033_v3 }

</bundles_post_ra>
